<compile_context>
chip_gen: v6e
topology: v6e:2x2x1
jax: 0.10.0
libtpu: 0.0.40
codegen_flags: <defaults>
</compile_context>

<pallas_src>
import jax
import jax.numpy as jnp
from jax.experimental import pallas as pl
from jax.experimental.pallas import tpu as pltpu

_LANE = 128


def _cbn_kernel(xr_ref, xi_ref, p_ref, or_ref, oi_ref):
    xr = xr_ref[...]                      # [N, TILE_C] float32 (real part)
    xi = xi_ref[...]                      # [N, TILE_C] float32 (imag part)
    n = xr.shape[0]                       # global batch size (batch not tiled)

    # ---- batch statistics (reduction over batch / sublane axis only) ----
    inv_n = 1.0 / n
    mean_r = jnp.sum(xr, axis=0, keepdims=True) * inv_n       # [1, TILE_C]
    mean_i = jnp.sum(xi, axis=0, keepdims=True) * inv_n       # [1, TILE_C]
    dr = xr - mean_r                                          # centered (vregs only,
    di = xi - mean_i                                          #  not re-used for output)

    # torch.var is unbiased (/(N-1)); covariance uses torch.mean (/N).
    inv_nm1 = 1.0 / (n - 1)
    var_r = jnp.sum(dr * dr, axis=0, keepdims=True) * inv_nm1 + 1e-5
    var_i = jnp.sum(di * di, axis=0, keepdims=True) * inv_nm1 + 1e-5
    cov_ri = jnp.sum(dr * di, axis=0, keepdims=True) * inv_n

    # ---- inv_sqrt_2x2 of [var_r, var_i, cov_ri]  (all [1, TILE_C]) ----
    s = jnp.sqrt(var_r * var_i - cov_ri * cov_ri)
    t = jnp.sqrt(var_r + var_i + 2.0 * s)
    # Exact reciprocal kept for bit-level parity with the reference; operand
    # is only [1, TILE_C] so it is off the critical path.
    inv_ts = pl.reciprocal(t * s, approx=False)
    m0 = inv_ts * (var_i + s)
    m1 = inv_ts * (var_r + s)
    m2 = inv_ts * (-cov_ri)

    # ---- affine parameters (coalesced [5, TILE_C]: w0, w1, w2, b_r, b_i) ----
    w0 = p_ref[0:1, :]
    w1 = p_ref[1:2, :]
    w2 = p_ref[2:3, :]
    b_r = p_ref[3:4, :]
    b_i = p_ref[4:5, :]
    wvr = w0 * w0
    wvi = w1 * w1
    wcov = jnp.sqrt(wvr * wvi) * (jax.nn.sigmoid(w2) * 2.0 - 1.0)

    # ---- fuse (center -> whiten -> affine -> bias) into one 2x2 + bias ----
    c00 = wvr * m0 + wcov * m2
    c01 = wvr * m2 + wcov * m1
    c10 = wcov * m0 + wvi * m2
    c11 = wcov * m2 + wvi * m1
    eb_r = b_r - (c00 * mean_r + c01 * mean_i)                # effective biases
    eb_i = b_i - (c10 * mean_r + c11 * mean_i)

    or_ref[...] = c00 * xr + c01 * xi + eb_r
    oi_ref[...] = c10 * xr + c11 * xi + eb_i


def _choose_tile_c(n, c):
    """Pick a lane-dense channel tile and a need-derived VMEM limit.

    VMEM model per grid step (float32):
      * 4 streamed [N, tile_c] slabs (xr, xi, out_r, out_i), double-buffered
        by the Pallas pipeline -> 8 copies,
      * ~4 extra [N, tile_c] slabs of headroom for compiler temporaries
        (centered slabs, partial products),
      * 2 double-buffered [5, tile_c] param blocks (negligible).
    """
    c128 = pl.cdiv(c, _LANE) * _LANE      # lane-dense channel extent
    slabs = 12
    bytes_per_col = slabs * n * 4         # bytes per 1-lane channel column
    data_budget = 20 * 1024 * 1024        # well under v7x's 64 MiB VMEM
    max_tile = (data_budget // bytes_per_col) // _LANE * _LANE
    if max_tile < _LANE:
        # TODO(synk): add a batch-tile ("arbitrary") grid axis with two-phase
        # stats accumulation instead of erroring for very large N.
        raise ValueError(
            f"batch size {n} is too large for the un-tiled batch dimension: "
            f"a single 128-lane channel tile needs {bytes_per_col * _LANE} "
            f"bytes of VMEM, exceeding the {data_budget}-byte budget")
    tile_c = min(c128, max_tile)

    # v7x has 2 TensorCores: keep the "parallel" channel grid at >= 2 steps
    # whenever there are >= 2 lane groups (no effect on 1-TC v5e/v6e).
    if c128 >= 2 * _LANE:
        half = pl.cdiv(c128 // _LANE, 2) * _LANE
        tile_c = min(tile_c, half)

    # Honest VMEM limit: actual modeled need plus modest slack, capped well
    # below v7x's 64 MiB physical VMEM.
    need = slabs * n * tile_c * 4 + 2 * 5 * tile_c * 4
    vmem_limit = int(min(40 * 1024 * 1024, max(8 * 1024 * 1024, need + 4 * 1024 * 1024)))
    return int(tile_c), vmem_limit


def complex_batchnorm_forward(xr, xi, weight, bias_r, bias_i):
    """Forward pass of Complex_BatchNorm (training mode, affine=True).

    Args:
      xr, xi:   [N, C] float32 real / imag parts of the complex input.
      weight:   [3, C] float32 affine parameter.
      bias_r:   [1, C] float32 real part of the complex bias.
      bias_i:   [1, C] float32 imag part of the complex bias.
    Returns:
      (out_r, out_i): [N, C] float32 pair.
    """
    n, c = xr.shape
    assert n >= 2, "training-mode batch statistics require N >= 2 (unbiased var)"

    tile_c, vmem_limit = _choose_tile_c(n, c)
    grid = (pl.cdiv(c, tile_c),)
    col = lambda j: (0, j)

    # Tiny [5, C] param slab (negligible copy); big [N, C] slabs are NOT
    # padded or sliced — the partial last channel tile is handled by Pallas'
    # masked loads/stores (safe: all channel lanes are independent).
    params = jnp.concatenate([weight, bias_r, bias_i], axis=0)

    out_r, out_i = pl.pallas_call(
        _cbn_kernel,
        grid=grid,
        in_specs=[
            pl.BlockSpec((n, tile_c), col),      # xr
            pl.BlockSpec((n, tile_c), col),      # xi
            pl.BlockSpec((5, tile_c), col),      # [weight; bias_r; bias_i]
        ],
        out_specs=(
            pl.BlockSpec((n, tile_c), col),
            pl.BlockSpec((n, tile_c), col),
        ),
        out_shape=(
            jax.ShapeDtypeStruct((n, c), jnp.float32),
            jax.ShapeDtypeStruct((n, c), jnp.float32),
        ),
        compiler_params=pltpu.CompilerParams(
            dimension_semantics=("parallel",),
            vmem_limit_bytes=vmem_limit,
        ),
    )(xr, xi, params)

    return out_r, out_i


def _reference_forward(xr, xi, weight, bias_r, bias_i):
    """Plain-JAX mirror of the PyTorch forward (training path) for checking."""
    n = xr.shape[0]
    mean_r = jnp.mean(xr, axis=0, keepdims=True)
    mean_i = jnp.mean(xi, axis=0, keepdims=True)
    xr_c = xr - mean_r
    xi_c = xi - mean_i
    var_r = jnp.sum(xr_c**2, axis=0, keepdims=True) / (n - 1) + 1e-5
    var_i = jnp.sum(xi_c**2, axis=0, keepdims=True) / (n - 1) + 1e-5
    cov = jnp.mean(xr_c * xi_c, axis=0, keepdims=True)
    s = jnp.sqrt(var_r * var_i - cov**2)
    t = jnp.sqrt(var_r + var_i + 2 * s)
    f = 1.0 / (t * s)
    m0, m1, m2 = f * (var_i + s), f * (var_r + s), f * (-cov)
    yr = m0 * xr_c + m2 * xi_c
    yi = m2 * xr_c + m1 * xi_c
    wvr = weight[0:1] ** 2
    wvi = weight[1:2] ** 2
    wc = jnp.sqrt(wvr * wvi) * (jax.nn.sigmoid(weight[2:3]) * 2 - 1)
    zr = wvr * yr + wc * yi
    zi = wc * yr + wvi * yi
    return zr + bias_r, zi + bias_i


def _make_inputs(key, n, c):
    k1, k2, k3, k4, k5 = jax.random.split(key, 5)
    xr = jax.random.normal(k1, (n, c), dtype=jnp.float32) * 2.0 + 0.5
    xi = jax.random.normal(k2, (n, c), dtype=jnp.float32) * 1.5 - 0.3
    weight = jnp.concatenate(
        [
            jnp.ones((2, c), jnp.float32)
            + 0.1 * jax.random.normal(k3, (2, c), dtype=jnp.float32),
            0.2 * jax.random.normal(k4, (1, c), dtype=jnp.float32),
        ],
        axis=0,
    )
    bias_c = 0.1 * jax.random.normal(k5, (2, c), dtype=jnp.float32)
    return xr, xi, weight, bias_c[0:1], bias_c[1:2]


if __name__ == "__main__":
    key = jax.random.PRNGKey(0)
    k_a, k_b = jax.random.split(key, 2)

    # Small, module-like shape (batch=8, num_channel=32): exercises the
    # single-tile path with a partial (masked) channel tile (32 of 128 lanes).
    xr, xi, w, br, bi = _make_inputs(k_a, 8, 32)
    out_r, out_i = complex_batchnorm_forward(xr, xi, w, br, bi)
    jax.block_until_ready((out_r, out_i))
    ref_r, ref_i = _reference_forward(xr, xi, w, br, bi)
    assert out_r.shape == (8, 32) and out_i.shape == (8, 32)
    assert jnp.allclose(out_r, ref_r, atol=1e-4, rtol=1e-4)
    assert jnp.allclose(out_i, ref_i, atol=1e-4, rtol=1e-4)

    # Wider channel count (batch=16, num_channel=1500): exercises a 2-step
    # "parallel" channel grid (tile_c=768) with a partial last tile and no
    # wrapper-side pad/slice copies.
    xr2, xi2, w2, br2, bi2 = _make_inputs(k_b, 16, 1500)
    out_r2, out_i2 = complex_batchnorm_forward(xr2, xi2, w2, br2, bi2)
    jax.block_until_ready((out_r2, out_i2))
    ref_r2, ref_i2 = _reference_forward(xr2, xi2, w2, br2, bi2)
    assert out_r2.shape == (16, 1500) and out_i2.shape == (16, 1500)
    assert jnp.allclose(out_r2, ref_r2, atol=1e-4, rtol=1e-4)
    assert jnp.allclose(out_i2, ref_i2, atol=1e-4, rtol=1e-4)

    print("KERNEL_OK")
</pallas_src>

<mosaic_0001>
module attributes {stable_mosaic.version = 11 : i64} {
  func.func @_cbn_kernel(%arg0: i32, %arg1: memref<8x128xf32, #tpu.memory_space<vmem>>, %arg2: memref<8x128xf32, #tpu.memory_space<vmem>>, %arg3: memref<5x128xf32, #tpu.memory_space<vmem>>, %arg4: memref<8x128xf32, #tpu.memory_space<vmem>>, %arg5: memref<8x128xf32, #tpu.memory_space<vmem>>) attributes {dimension_semantics = [#tpu.dimension_semantics<parallel>], iteration_bounds = array<i64: 1>, scalar_prefetch = 0 : i64, scratch_operands = 0 : i64, tpu.core_type = #tpu.core_type<tc>, window_params = [{transform_indices = @transform_0, window_bounds = array<i64: 8, 128>}, {transform_indices = @transform_1, window_bounds = array<i64: 8, 128>}, {transform_indices = @transform_2, window_bounds = array<i64: 5, 128>}, {transform_indices = @transform_3, window_bounds = array<i64: 8, 128>}, {transform_indices = @transform_4, window_bounds = array<i64: 8, 128>}]} {
    %c0 = arith.constant 0 : index
    %c0_0 = arith.constant 0 : index
    %0 = vector.load %arg1[%c0, %c0_0] : memref<8x128xf32, #tpu.memory_space<vmem>>, vector<8x128xf32>
    %c0_1 = arith.constant 0 : index
    %c0_2 = arith.constant 0 : index
    %1 = vector.load %arg2[%c0_1, %c0_2] : memref<8x128xf32, #tpu.memory_space<vmem>>, vector<8x128xf32>
    %cst = arith.constant dense<0.000000e+00> : vector<128xf32>
    %2 = vector.multi_reduction <add>, %0, %cst [0] : vector<8x128xf32> to vector<128xf32>
    %3 = vector.shape_cast %2 : vector<128xf32> to vector<1x128xf32>
    %cst_3 = arith.constant 1.250000e-01 : f32
    %4 = vector.broadcast %cst_3 : f32 to vector<1x128xf32>
    %5 = arith.mulf %3, %4 : vector<1x128xf32>
    %cst_4 = arith.constant dense<0.000000e+00> : vector<128xf32>
    %6 = vector.multi_reduction <add>, %1, %cst_4 [0] : vector<8x128xf32> to vector<128xf32>
    %7 = vector.shape_cast %6 : vector<128xf32> to vector<1x128xf32>
    %cst_5 = arith.constant 1.250000e-01 : f32
    %8 = vector.broadcast %cst_5 : f32 to vector<1x128xf32>
    %9 = arith.mulf %7, %8 : vector<1x128xf32>
    %10 = vector.broadcast %5 : vector<1x128xf32> to vector<8x128xf32>
    %11 = arith.subf %0, %10 : vector<8x128xf32>
    %12 = vector.broadcast %9 : vector<1x128xf32> to vector<8x128xf32>
    %13 = arith.subf %1, %12 : vector<8x128xf32>
    %14 = arith.mulf %11, %11 : vector<8x128xf32>
    %cst_6 = arith.constant dense<0.000000e+00> : vector<128xf32>
    %15 = vector.multi_reduction <add>, %14, %cst_6 [0] : vector<8x128xf32> to vector<128xf32>
    %16 = vector.shape_cast %15 : vector<128xf32> to vector<1x128xf32>
    %cst_7 = arith.constant 0.142857149 : f32
    %17 = vector.broadcast %cst_7 : f32 to vector<1x128xf32>
    %18 = arith.mulf %16, %17 : vector<1x128xf32>
    %cst_8 = arith.constant 9.99999974E-6 : f32
    %19 = vector.broadcast %cst_8 : f32 to vector<1x128xf32>
    %20 = arith.addf %18, %19 : vector<1x128xf32>
    %21 = arith.mulf %13, %13 : vector<8x128xf32>
    %cst_9 = arith.constant dense<0.000000e+00> : vector<128xf32>
    %22 = vector.multi_reduction <add>, %21, %cst_9 [0] : vector<8x128xf32> to vector<128xf32>
    %23 = vector.shape_cast %22 : vector<128xf32> to vector<1x128xf32>
    %cst_10 = arith.constant 0.142857149 : f32
    %24 = vector.broadcast %cst_10 : f32 to vector<1x128xf32>
    %25 = arith.mulf %23, %24 : vector<1x128xf32>
    %cst_11 = arith.constant 9.99999974E-6 : f32
    %26 = vector.broadcast %cst_11 : f32 to vector<1x128xf32>
    %27 = arith.addf %25, %26 : vector<1x128xf32>
    %28 = arith.mulf %11, %13 : vector<8x128xf32>
    %cst_12 = arith.constant dense<0.000000e+00> : vector<128xf32>
    %29 = vector.multi_reduction <add>, %28, %cst_12 [0] : vector<8x128xf32> to vector<128xf32>
    %30 = vector.shape_cast %29 : vector<128xf32> to vector<1x128xf32>
    %cst_13 = arith.constant 1.250000e-01 : f32
    %31 = vector.broadcast %cst_13 : f32 to vector<1x128xf32>
    %32 = arith.mulf %30, %31 : vector<1x128xf32>
    %33 = arith.mulf %20, %27 : vector<1x128xf32>
    %34 = arith.mulf %32, %32 : vector<1x128xf32>
    %35 = arith.subf %33, %34 : vector<1x128xf32>
    %36 = math.sqrt %35 : vector<1x128xf32>
    %37 = arith.addf %20, %27 : vector<1x128xf32>
    %cst_14 = arith.constant 2.000000e+00 : f32
    %38 = vector.broadcast %cst_14 : f32 to vector<1x128xf32>
    %39 = arith.mulf %38, %36 : vector<1x128xf32>
    %40 = arith.addf %37, %39 : vector<1x128xf32>
    %41 = math.sqrt %40 : vector<1x128xf32>
    %42 = arith.mulf %41, %36 : vector<1x128xf32>
    %43 = tpu.reciprocal %42 : vector<1x128xf32> -> vector<1x128xf32>
    %44 = arith.addf %27, %36 : vector<1x128xf32>
    %45 = arith.mulf %43, %44 : vector<1x128xf32>
    %46 = arith.addf %20, %36 : vector<1x128xf32>
    %47 = arith.mulf %43, %46 : vector<1x128xf32>
    %cst_15 = arith.constant 0.000000e+00 : f32
    %48 = vector.broadcast %cst_15 : f32 to vector<1x128xf32>
    %49 = arith.subf %48, %32 : vector<1x128xf32>
    %50 = arith.mulf %43, %49 : vector<1x128xf32>
    %c0_16 = arith.constant 0 : index
    %c0_17 = arith.constant 0 : index
    %51 = vector.load %arg3[%c0_16, %c0_17] : memref<5x128xf32, #tpu.memory_space<vmem>>, vector<1x128xf32>
    %c1 = arith.constant 1 : index
    %c0_18 = arith.constant 0 : index
    %52 = vector.load %arg3[%c1, %c0_18] : memref<5x128xf32, #tpu.memory_space<vmem>>, vector<1x128xf32>
    %c2 = arith.constant 2 : index
    %c0_19 = arith.constant 0 : index
    %53 = vector.load %arg3[%c2, %c0_19] : memref<5x128xf32, #tpu.memory_space<vmem>>, vector<1x128xf32>
    %c3 = arith.constant 3 : index
    %c0_20 = arith.constant 0 : index
    %54 = vector.load %arg3[%c3, %c0_20] : memref<5x128xf32, #tpu.memory_space<vmem>>, vector<1x128xf32>
    %c4 = arith.constant 4 : index
    %c0_21 = arith.constant 0 : index
    %55 = vector.load %arg3[%c4, %c0_21] : memref<5x128xf32, #tpu.memory_space<vmem>>, vector<1x128xf32>
    %56 = arith.mulf %51, %51 : vector<1x128xf32>
    %57 = arith.mulf %52, %52 : vector<1x128xf32>
    %58 = arith.mulf %56, %57 : vector<1x128xf32>
    %59 = math.sqrt %58 : vector<1x128xf32>
    %60 = arith.negf %53 : vector<1x128xf32>
    %61 = math.exp %60 : vector<1x128xf32>
    %cst_22 = arith.constant 1.000000e+00 : f32
    %62 = vector.broadcast %cst_22 : f32 to vector<1x128xf32>
    %63 = arith.addf %62, %61 : vector<1x128xf32>
    %64 = arith.divf %62, %63 : vector<1x128xf32>
    %cst_23 = arith.constant 2.000000e+00 : f32
    %65 = vector.broadcast %cst_23 : f32 to vector<1x128xf32>
    %66 = arith.mulf %64, %65 : vector<1x128xf32>
    %cst_24 = arith.constant 1.000000e+00 : f32
    %67 = vector.broadcast %cst_24 : f32 to vector<1x128xf32>
    %68 = arith.subf %66, %67 : vector<1x128xf32>
    %69 = arith.mulf %59, %68 : vector<1x128xf32>
    %70 = arith.mulf %56, %45 : vector<1x128xf32>
    %71 = arith.mulf %69, %50 : vector<1x128xf32>
    %72 = arith.addf %70, %71 : vector<1x128xf32>
    %73 = arith.mulf %56, %50 : vector<1x128xf32>
    %74 = arith.mulf %69, %47 : vector<1x128xf32>
    %75 = arith.addf %73, %74 : vector<1x128xf32>
    %76 = arith.mulf %69, %45 : vector<1x128xf32>
    %77 = arith.mulf %57, %50 : vector<1x128xf32>
    %78 = arith.addf %76, %77 : vector<1x128xf32>
    %79 = arith.mulf %69, %50 : vector<1x128xf32>
    %80 = arith.mulf %57, %47 : vector<1x128xf32>
    %81 = arith.addf %79, %80 : vector<1x128xf32>
    %82 = arith.mulf %72, %5 : vector<1x128xf32>
    %83 = arith.mulf %75, %9 : vector<1x128xf32>
    %84 = arith.addf %82, %83 : vector<1x128xf32>
    %85 = arith.subf %54, %84 : vector<1x128xf32>
    %86 = arith.mulf %78, %5 : vector<1x128xf32>
    %87 = arith.mulf %81, %9 : vector<1x128xf32>
    %88 = arith.addf %86, %87 : vector<1x128xf32>
    %89 = arith.subf %55, %88 : vector<1x128xf32>
    %90 = vector.broadcast %72 : vector<1x128xf32> to vector<8x128xf32>
    %91 = arith.mulf %90, %0 : vector<8x128xf32>
    %92 = vector.broadcast %75 : vector<1x128xf32> to vector<8x128xf32>
    %93 = arith.mulf %92, %1 : vector<8x128xf32>
    %94 = arith.addf %91, %93 : vector<8x128xf32>
    %95 = vector.broadcast %85 : vector<1x128xf32> to vector<8x128xf32>
    %96 = arith.addf %94, %95 : vector<8x128xf32>
    %c0_25 = arith.constant 0 : index
    %c0_26 = arith.constant 0 : index
    %97 = vector.load %arg4[%c0_25, %c0_26] : memref<8x128xf32, #tpu.memory_space<vmem>>, vector<8x128xf32>
    tpu.vector_store %arg4[%c0_25, %c0_26], %96 {strides = array<i32>} : memref<8x128xf32, #tpu.memory_space<vmem>>, vector<8x128xf32>,
    %98 = vector.broadcast %78 : vector<1x128xf32> to vector<8x128xf32>
    %99 = arith.mulf %98, %0 : vector<8x128xf32>
    %100 = vector.broadcast %81 : vector<1x128xf32> to vector<8x128xf32>
    %101 = arith.mulf %100, %1 : vector<8x128xf32>
    %102 = arith.addf %99, %101 : vector<8x128xf32>
    %103 = vector.broadcast %89 : vector<1x128xf32> to vector<8x128xf32>
    %104 = arith.addf %102, %103 : vector<8x128xf32>
    %c0_27 = arith.constant 0 : index
    %c0_28 = arith.constant 0 : index
    %105 = vector.load %arg5[%c0_27, %c0_28] : memref<8x128xf32, #tpu.memory_space<vmem>>, vector<8x128xf32>
    tpu.vector_store %arg5[%c0_27, %c0_28], %104 {strides = array<i32>} : memref<8x128xf32, #tpu.memory_space<vmem>>, vector<8x128xf32>,
    return
  }
  func.func @transform_0(%arg0: i32) -> (i32, i32) {
    %c0_i32 = arith.constant 0 : i32
    %c0_i32_0 = arith.constant 0 : i32
    return %c0_i32, %arg0 : i32, i32
  }
  func.func @transform_1(%arg0: i32) -> (i32, i32) {
    %c0_i32 = arith.constant 0 : i32
    %c0_i32_0 = arith.constant 0 : i32
    return %c0_i32, %arg0 : i32, i32
  }
  func.func @transform_2(%arg0: i32) -> (i32, i32) {
    %c0_i32 = arith.constant 0 : i32
    %c0_i32_0 = arith.constant 0 : i32
    return %c0_i32, %arg0 : i32, i32
  }
  func.func @transform_3(%arg0: i32) -> (i32, i32) {
    %c0_i32 = arith.constant 0 : i32
    %c0_i32_0 = arith.constant 0 : i32
    return %c0_i32, %arg0 : i32, i32
  }
  func.func @transform_4(%arg0: i32) -> (i32, i32) {
    %c0_i32 = arith.constant 0 : i32
    %c0_i32_0 = arith.constant 0 : i32
    return %c0_i32, %arg0 : i32, i32
  }
}

</mosaic_0001>

<bundles_post_ra>
// kernel: tpu_custom_call.1
= control target key start
LH: loop header
LB: loop body
LE: loop exit
PB: predicated region body
PF: predicated region fallthrough
CT: control target
= control target key end

     0   :  { %10 = vsyncpa [#allocation3], 0  ;;  %s428_s0 = inlined_call_operand.hbm [shape: f32[8,32], index: 0, kind: input, shape index: {}]   ;;  %s429_s1 = inlined_call_operand.hbm [shape: f32[8,32], index: 1, kind: input, shape index: {}]   ;;  %s430_s2 = inlined_call_operand.hbm [shape: f32[5,32], index: 2, kind: input, shape index: {}]   ;;  %s431_s3 = inlined_call_operand.hbm [shape: f32[8,32], index: 3, kind: output, shape index: {0}]   ;;  %s432_s4 = inlined_call_operand.hbm [shape: f32[8,32], index: 4, kind: output, shape index: {1}]  }
   0x1   :  { %11 = vsyncpa [#allocation6], 0 }
   0x2   :  { %12 = vsyncpa [#allocation4], 0 }
   0x3   :  { %13 = vsyncpa [#allocation10], 0  ;;  %s359_s15 = smov [#allocation5]   ;;  %s360_s17 = smov [#allocation2]  }
   0x4   :  { %s30_s16 = sshll.u32 %s359_s15, 4  ;;  %s20_s18 = sshll.u32 %s360_s17, 4  ;;  %s31_s16 = int_to_ptr.vmem [resolvable:$true] %s30_s16  ;;  %s21_s18 = int_to_ptr.vmem [resolvable:$true] %s20_s18 }
   0x5   :  { %s259_s19 = scalar_lea.vmem %s31_s16, 128  ;;  %p264_p1 = scmp.lt.s32.totalorder %s31_s16, %s31_s16 }
   0x6   :  { %p260_p0 = scmp.ne.s32.totalorder %s31_s16, %s259_s19  ;;  %p265_p2 = scmp.lt.s32.totalorder %s259_s19, %s259_s19 }
   0x8   :  { %p266_p3 = por %p265_p2, %p264_p1 }
   0xa   :  { %p267_p4 = pnand %p266_p3, %p260_p0 }
   0xc   :  { %270 = shalt.err (!%p267_p4)
}
   0xd   :  { %33 = dma.hbm_to_vmem [thread:$0]  %s429_s1, 128, %s31_s16, [#allocation6]  }
   0xe   :  { %s279_s22 = scalar_lea.vmem %s21_s18, 128  ;;  %p284_p6 = scmp.lt.s32.totalorder %s21_s18, %s21_s18 }
   0xf   :  { %p280_p5 = scmp.ne.s32.totalorder %s21_s18, %s279_s22  ;;  %p285_p7 = scmp.lt.s32.totalorder %s279_s22, %s279_s22 }
  0x11   :  { %p286_p8 = por %p285_p7, %p284_p6 }
  0x13   :  { %p287_p9 = pnand %p286_p8, %p280_p5 }
  0x15   :  { %290 = shalt.err (!%p287_p9)
}
  0x16   :  { %23 = dma.hbm_to_vmem [thread:$0]  %s428_s0, 128, %s21_s18, [#allocation3]  }
  0x17   :  { %s361_s25 = smov [#allocation7]  }
  0x18   :  { %s40_s26 = sshll.u32 %s361_s25, 4  ;;  %s41_s26 = int_to_ptr.vmem [resolvable:$true] %s40_s26 }
  0x19   :  { %s299_s27 = scalar_lea.vmem %s41_s26, 128  ;;  %p304_p11 = scmp.lt.s32.totalorder %s41_s26, %s41_s26 }
  0x1a   :  { %p300_p10 = scmp.ne.s32.totalorder %s41_s26, %s299_s27  ;;  %p305_p12 = scmp.lt.s32.totalorder %s299_s27, %s299_s27 }
  0x1c   :  { %p306_p13 = por %p305_p12, %p304_p11 }
  0x1e   :  { %p307_p0 = pnand %p306_p13, %p300_p10 }
  0x20   :  { %310 = shalt.err (!%p307_p0)
}
  0x21   :  { %43 = dma.hbm_to_vmem [thread:$0]  %s430_s2, 128, %s41_s26, [#allocation6]  }
  0x22   :  { %351 = dma.done.wait [#allocation3], 128  }
  0x23   :  { %352 = vsyncadd [#allocation3], 4294967168 }
  0x24   :  { %353 = dma.done.wait [#allocation6], 256  }
  0x25   :  { %354 = vsyncadd [#allocation6], 4294967040  ;;  %v398_v0 = vld [vmem:[#allocation2] sm:$0xff]  ;;  %v400_v1 = vld [vmem:[#allocation5] sm:$0xff]  ;;  %s362_s0 = smov [#allocation8]   ;;  %s363_s29 = smov [#allocation9]  }
  0x26   :  { %v55_v2 = vrot.slane %v398_v0, 4  ;;  %v62_v3 = vrot.slane %v400_v1, 4  ;;  %v127_v47 = vld [vmem:[#allocation7 + $0x2] sm:$0x1]  ;;  %v125_v55 = vld [vmem:[#allocation7] sm:$0x1] }
  0x27   :  { %v232_v48 = vmul.f32 -1.442695, %v127_v47  ;;  %v126_v56 = vld [vmem:[#allocation7 + $0x1] sm:$0x1]  ;;  %v130_v59 = vmul.f32 %v125_v55, %v125_v55  ;;  %s208_s2 = sshll.u32 %s362_s0, 4  ;;  %s218_s30 = sshll.u32 %s363_s29, 4  ;;  %s209_s2 = int_to_ptr.vmem [resolvable:$true] %s208_s2  ;;  %s219_s30 = int_to_ptr.vmem [resolvable:$true] %s218_s30 }
  0x28   :  { %v56_v4 = vadd.f32 %v55_v2, %v398_v0  ;;  %v63_v5 = vadd.f32 %v62_v3, %v400_v1  ;;  %v131_v60 = vmul.f32 %v126_v56, %v126_v56  ;;  %s311_s5 = scalar_lea.vmem %s209_s2, 128  ;;  %p316_p2 = scmp.lt.s32.totalorder %s209_s2, %s209_s2 }
  0x29   :  { %p312_p1 = scmp.ne.s32.totalorder %s209_s2, %s311_s5  ;;  %p317_p3 = scmp.lt.s32.totalorder %s311_s5, %s311_s5 }
  0x2a   :  { %v57_v6 = vrot.slane %v56_v4, 2  ;;  %v64_v7 = vrot.slane %v63_v5, 2  ;;  %v132_v62 = vmul.f32 %v131_v60, %v130_v59 }
  0x2b   :  { %p318_p4 = por %p317_p3, %p316_p2 }
  0x2c   :  { %v58_v8 = vadd.f32 %v57_v6, %v56_v4  ;;  %v65_v9 = vadd.f32 %v64_v7, %v63_v5  ;;  %vm135_vm4 = vcmp.eq.f32.partialorder %v132_v62, inf  ;;  %vm137_vm5 = vcmp.eq.f32.partialorder %v132_v62, 0.0 }
  0x2d   :  { %p319_p5 = pnand %p318_p4, %p312_p1 }
  0x2e   :  { %v59_v10 = vrot.slane %v58_v8, 1  ;;  %v66_v11 = vrot.slane %v65_v9, 1 }
  0x30   :  { %v60_v12 = vadd.f32 %v59_v10, %v58_v8  ;;  %v67_v13 = vadd.f32 %v66_v11, %v65_v9 }
  0x32   :  { %v406_v14 = vmul.f32 0.125, %v60_v12  ;;  %v408_v15 = vmul.f32 0.125, %v67_v13  ;;  %v138_v12 = vand.u32 2147483648, %v132_v62 }
  0x34   :  { %v69_v16 = vsub.f32 %v398_v0, %v406_v14  ;;  %v70_v17 = vsub.f32 %v400_v1, %v408_v15 }
  0x36   :  { %v71_v18 = vmul.f32 %v69_v16, %v69_v16  ;;  %v80_v19 = vmul.f32 %v70_v17, %v70_v17  ;;  %v89_v20 = vmul.f32 %v70_v17, %v69_v16  ;;  %v168_v16 = vlaneseq }
  0x38   :  { %v72_v21 = vrot.slane %v71_v18, 4  ;;  %v81_v22 = vrot.slane %v80_v19, 4  ;;  %v90_v23 = vrot.slane %v89_v20, 4 }
  0x3a   :  { %v73_v24 = vadd.f32 %v72_v21, %v71_v18  ;;  %v82_v25 = vadd.f32 %v81_v22, %v80_v19  ;;  %v91_v26 = vadd.f32 %v90_v23, %v89_v20  ;;  %v169_v22 = vshrl.u32 %v168_v16, 7 }
  0x3c   :  { %v74_v27 = vrot.slane %v73_v24, 2  ;;  %v83_v28 = vrot.slane %v82_v25, 2  ;;  %v92_v29 = vrot.slane %v91_v26, 2 }
  0x3e   :  { %v75_v30 = vadd.f32 %v74_v27, %v73_v24  ;;  %v84_v31 = vadd.f32 %v83_v28, %v82_v25  ;;  %v93_v32 = vadd.f32 %v92_v29, %v91_v26  ;;  %v170_v28 = vsub.s32 0, %v169_v22 }
  0x40   :  { %v76_v33 = vrot.slane %v75_v30, 1  ;;  %v85_v34 = vrot.slane %v84_v31, 1  ;;  %v94_v35 = vrot.slane %v93_v32, 1 }
  0x42   :  { %v77_v36 = vadd.f32 %v76_v33, %v75_v30  ;;  %v86_v37 = vadd.f32 %v85_v34, %v84_v31  ;;  %v95_v38 = vadd.f32 %v94_v35, %v93_v32 }
  0x44   :  { %v78_v39 = vmul.f32 0.14285715, %v77_v36  ;;  %v87_v40 = vmul.f32 0.14285715, %v86_v37  ;;  %v96_v41 = vmul.f32 0.125, %v95_v38 }
  0x46   :  { %v79_v42 = vadd.f32 1e-05, %v78_v39  ;;  %v88_v43 = vadd.f32 1e-05, %v87_v40  ;;  %v98_v44 = vmul.f32 %v96_v41, %v96_v41  ;;  %v123_v21 = vsub.f32 0.0, %v96_v41 }
  0x48   :  { %v97_v45 = vmul.f32 %v88_v43, %v79_v42  ;;  %v107_v53 = vadd.f32 %v88_v43, %v79_v42 }
  0x4a   :  { %v99_v46 = vsub.f32 %v97_v45, %v98_v44  ;;  %v128_v44 = vld [vmem:[#allocation7 + $0x3] sm:$0x1] }
  0x4c   :  { %239 = vrsqrt.f32 %v99_v46  ;;  %vm102_vm0 = vcmp.eq.f32.partialorder %v99_v46, inf  ;;  %v105_v50 = vand.u32 2147483648, %v99_v46  ;;  %vm104_vm1 = vcmp.eq.f32.partialorder %v99_v46, 0.0 }
  0x4d   :  { %241 = vpow2.f32 %v232_v48 }
  0x59   :  { %v240_v49 = vpop.eup %239 }
  0x5a   :  { %v101_v51 = vmul.f32 %v240_v49, %v99_v46  ;;  %v242_v61 = vpop.eup %241 }
  0x5b   :  { %v143_v63 = vadd.f32 1.0, %v242_v61 }
  0x5c   :  { %v103_v52 = vsel %vm102_vm0, %v99_v46, %v101_v51 }
  0x5d   :  { %v106_v54 = vsel %vm104_vm1, %v105_v50, %v103_v52  ;;  %v129_v52 = vld [vmem:[#allocation7 + $0x4] sm:$0x1] }
  0x5e   :  { %v108_v57 = vmul.f32 2.0, %v106_v54  ;;  %v119_v19 = vadd.f32 %v106_v54, %v88_v43  ;;  %v121_v20 = vadd.f32 %v106_v54, %v79_v42 }
  0x60   :  { %v109_v58 = vadd.f32 %v108_v57, %v107_v53 }
  0x62   :  { %243 = vrsqrt.f32 %v109_v58  ;;  %vm112_vm2 = vcmp.eq.f32.partialorder %v109_v58, inf  ;;  %v115_v3 = vand.u32 2147483648, %v109_v58  ;;  %vm114_vm3 = vcmp.eq.f32.partialorder %v109_v58, 0.0 }
  0x63   :  { %245 = vrsqrt.f32 %v132_v62 }
  0x64   :  { %247 = vrcp.f32 %v143_v63 }
  0x6f   :  { %v244_v2 = vpop.eup %243 }
  0x70   :  { %v111_v4 = vmul.f32 %v244_v2, %v109_v58  ;;  %v246_v8 = vpop.eup %245 }
  0x71   :  { %v248_v9 = vpop.eup %247  ;;  %v134_v10 = vmul.f32 %v246_v8, %v132_v62 }
  0x72   :  { %v113_v5 = vsel %vm112_vm2, %v109_v58, %v111_v4  ;;  %v146_v11 = vmul.f32 2.0, %v248_v9 }
  0x73   :  { %v116_v6 = vsel %vm114_vm3, %v115_v3, %v113_v5  ;;  %v136_v13 = vsel %vm135_vm4, %v132_v62, %v134_v10 }
  0x74   :  { %v117_v7 = vmul.f32 %v116_v6, %v106_v54  ;;  %v233_v17 = vadd.f32 -1.0, %v146_v11  ;;  %v139_v18 = vsel %vm137_vm5, %v138_v12, %v136_v13 }
  0x76   :  { %249 = vrcp.f32 %v117_v7  ;;  %v148_v23 = vmul.f32 %v233_v17, %v139_v18 }
  0x83   :  { %v250_v24 = vpop.eup %249 }
  0x84   :  { %v120_v25 = vmul.f32 %v250_v24, %v119_v19  ;;  %v122_v26 = vmul.f32 %v250_v24, %v121_v20  ;;  %v124_v27 = vmul.f32 %v250_v24, %v123_v21 }
  0x86   :  { %v149_v29 = vmul.f32 %v130_v59, %v120_v25  ;;  %v150_v30 = vmul.f32 %v148_v23, %v124_v27  ;;  %v152_v31 = vmul.f32 %v130_v59, %v124_v27  ;;  %v153_v32 = vmul.f32 %v148_v23, %v122_v26 }
  0x87   :  { %v155_v33 = vmul.f32 %v148_v23, %v120_v25  ;;  %v156_v34 = vmul.f32 %v131_v60, %v124_v27  ;;  %v158_v35 = vmul.f32 %v131_v60, %v122_v26 }
  0x88   :  { %v151_v36 = vadd.f32 %v150_v30, %v149_v29  ;;  %v154_v37 = vadd.f32 %v153_v32, %v152_v31 }
  0x89   :  { %v157_v38 = vadd.f32 %v156_v34, %v155_v33  ;;  %v159_v39 = vadd.f32 %v158_v35, %v150_v30 }
  0x8a   :  { %v160_v40 = vmul.f32 %v151_v36, %v406_v14  ;;  %v161_v41 = vmul.f32 %v154_v37, %v408_v15  ;;  %v171_v42 = vrot.slane %v151_v36, %v170_v28  ;;  %v176_v43 = vrot.slane %v154_v37, %v170_v28 }
  0x8b   :  { %v164_v45 = vmul.f32 %v157_v38, %v406_v14  ;;  %v165_v46 = vmul.f32 %v159_v39, %v408_v15  ;;  %v188_v47 = vrot.slane %v157_v38, %v170_v28  ;;  %v193_v48 = vrot.slane %v159_v39, %v170_v28 }
  0x8c   :  { %v162_v49 = vadd.f32 %v161_v41, %v160_v40  ;;  %v172_v50 = vmul.f32 %v171_v42, %v398_v0  ;;  %v177_v51 = vmul.f32 %v176_v43, %v400_v1 }
  0x8d   :  { %v166_v53 = vadd.f32 %v165_v46, %v164_v45  ;;  %v189_v54 = vmul.f32 %v188_v47, %v398_v0  ;;  %v194_v55 = vmul.f32 %v193_v48, %v400_v1 }
  0x8e   :  { %v163_v56 = vsub.f32 %v128_v44, %v162_v49  ;;  %v178_v57 = vadd.f32 %v177_v51, %v172_v50 }
  0x8f   :  { %v167_v58 = vsub.f32 %v129_v52, %v166_v53  ;;  %v195_v59 = vadd.f32 %v194_v55, %v189_v54 }
  0x90   :  { %v182_v14 = vrot.slane %v163_v56, %v170_v28 }
  0x91   :  { %v199_v15 = vrot.slane %v167_v58, %v170_v28 }
  0x92   :  { %v183_v60 = vadd.f32 %v182_v14, %v178_v57 }
  0x93   :  { %v200_v61 = vadd.f32 %v199_v15, %v195_v59 }
  0x94   :  { %184 = vst [vmem:[#allocation8] sm:$0xff] %v183_v60 }
  0x95   :  { %201 = vst [vmem:[#allocation9] sm:$0xff] %v200_v61 }
  0x96   :  { %322 = shalt.err (!%p319_p5)
}
  0x97   :  { %211 = dma.vmem_to_hbm [thread:$0]  %s209_s2, 128, %s431_s3, [#allocation4]  }
  0x98   :  { %s331_s8 = scalar_lea.vmem %s219_s30, 128  ;;  %p336_p7 = scmp.lt.s32.totalorder %s219_s30, %s219_s30 }
  0x99   :  { %p332_p6 = scmp.ne.s32.totalorder %s219_s30, %s331_s8  ;;  %p337_p8 = scmp.lt.s32.totalorder %s331_s8, %s331_s8 }
  0x9b   :  { %p338_p9 = por %p337_p8, %p336_p7 }
  0x9d   :  { %p339_p10 = pnand %p338_p9, %p332_p6 }
  0x9f   :  { %342 = shalt.err (!%p339_p10)
}
  0xa0   :  { %221 = dma.vmem_to_hbm [thread:$0]  %s219_s30, 128, %s432_s4, [#allocation10]  }
  0xa1   :  { %355 = dma.done.wait [#allocation4], 128  }
  0xa2   :  { %356 = vsyncadd [#allocation4], 4294967168 }
  0xa3   :  { %357 = dma.done.wait [#allocation10], 128  }
  0xa4   :  { %358 = vsyncadd [#allocation10], 4294967168 }
  0xa5   :  { %228 = vsyncpa [#allocation3], 1 }
  0xa6   :  { %229 = vsyncpa [#allocation6], 1 }
  0xa7   :  { %230 = vsyncpa [#allocation4], 1 }
  0xa8   :  { %231 = vsyncpa [#allocation10], 1 }

</bundles_post_ra>
